<compile_context>
chip_gen: v5e
topology: v5e:2x2
jax: 0.10.0
libtpu: 0.0.40
codegen_flags: <defaults>
</compile_context>

<pallas_src>
import functools
import math

import jax
import jax.numpy as jnp
from jax.experimental import pallas as pl
from jax.experimental.pallas import tpu as pltpu

LN_EPS = 1e-5  # PyTorch nn.LayerNorm default


def _layer_norm(v, gamma, beta):
    mean = jnp.mean(v, axis=-1, keepdims=True)
    var = jnp.mean(jnp.square(v - mean), axis=-1, keepdims=True)
    return (v - mean) * jax.lax.rsqrt(var + LN_EPS) * gamma + beta


# --------------------------------------------------------------------------
# Kernel 1: LN1 + QKV proj + multi-head attention + out_proj + residual
# --------------------------------------------------------------------------
def _attn_block_kernel(x_ref, g1_ref, b1_ref, wqkv_ref, bqkv_ref,
                       wo_ref, bo_ref, o_ref, attn_scratch,
                       *, num_heads, head_dim):
    x = x_ref[0].astype(jnp.float32)                               # (T, D)
    d_model = num_heads * head_dim

    xn = _layer_norm(x, g1_ref[...], b1_ref[...])                  # (T, D)
    qkv = jnp.dot(xn, wqkv_ref[...],
                  preferred_element_type=jnp.float32) + bqkv_ref[...]  # (T, 3D)

    scale = 1.0 / math.sqrt(head_dim)
    for h in range(num_heads):                                     # static loop
        lo = h * head_dim
        hi = lo + head_dim
        q = qkv[:, lo:hi]                                          # (T, hd)
        k = qkv[:, d_model + lo:d_model + hi]                      # (T, hd)
        v = qkv[:, 2 * d_model + lo:2 * d_model + hi]              # (T, hd)
        s = jnp.dot(q, k.T, preferred_element_type=jnp.float32) * scale
        s = s - jnp.max(s, axis=-1, keepdims=True)                 # stable softmax
        p = jnp.exp(s)
        p = p / jnp.sum(p, axis=-1, keepdims=True)
        attn_scratch[:, lo:hi] = jnp.dot(p, v,
                                         preferred_element_type=jnp.float32)

    attn = attn_scratch[...]                                       # (T, D)
    proj = jnp.dot(attn, wo_ref[...],
                   preferred_element_type=jnp.float32) + bo_ref[...]
    o_ref[0] = (x + proj).astype(o_ref.dtype)                      # residual


# --------------------------------------------------------------------------
# Kernel 2: LN2 + FC1 + ReLU + FC2 + residual
# --------------------------------------------------------------------------
def _mlp_block_kernel(y_ref, g2_ref, b2_ref, w1_ref, bv1_ref, w2_ref, bv2_ref,
                      o_ref):
    y = y_ref[0].astype(jnp.float32)                               # (TS, D)
    yn = _layer_norm(y, g2_ref[...], b2_ref[...])
    h = jnp.dot(yn, w1_ref[...],
                preferred_element_type=jnp.float32) + bv1_ref[...]
    h = jnp.maximum(h, 0.0)
    out = jnp.dot(h, w2_ref[...],
                  preferred_element_type=jnp.float32) + bv2_ref[...]
    o_ref[0] = (y + out).astype(o_ref.dtype)                       # residual


def _seq_tile(seq_len, d_model, bytes_per_elem=4, target_bytes=2 << 20):
    """Pick a sequence tile for the MLP kernel (only when (8,128) tiling allows)."""
    if d_model % 128 != 0 or seq_len % 8 != 0:
        return seq_len                              # must use full-extent block
    ts = max(8, min(seq_len, target_bytes // (d_model * bytes_per_elem)))
    ts -= ts % 8
    while ts > 8 and seq_len % ts != 0:
        ts -= 8
    return ts if seq_len % ts == 0 else seq_len


# --------------------------------------------------------------------------
# Wrapper
# --------------------------------------------------------------------------
def transformer_encoder_layer_forward(x, params, num_heads):
    B, T, D = x.shape
    assert D % num_heads == 0
    head_dim = D // num_heads
    vmem_cap = 32 * 1024 * 1024

    # ---- attention block: grid over batch, weights broadcast (VMEM-resident)
    wspec1 = lambda shape: pl.BlockSpec(shape, lambda b: (0, 0))
    y = pl.pallas_call(
        functools.partial(_attn_block_kernel,
                          num_heads=num_heads, head_dim=head_dim),
        out_shape=jax.ShapeDtypeStruct((B, T, D), x.dtype),
        grid=(B,),
        in_specs=[
            pl.BlockSpec((1, T, D), lambda b: (b, 0, 0)),
            wspec1((1, D)), wspec1((1, D)),
            wspec1((D, 3 * D)), wspec1((1, 3 * D)),
            wspec1((D, D)), wspec1((1, D)),
        ],
        out_specs=pl.BlockSpec((1, T, D), lambda b: (b, 0, 0)),
        scratch_shapes=[pltpu.VMEM((T, D), jnp.float32)],
        compiler_params=pltpu.CompilerParams(
            dimension_semantics=("parallel",),
            vmem_limit_bytes=vmem_cap),
    )(x, params["ln1_g"], params["ln1_b"], params["w_qkv"], params["b_qkv"],
      params["w_out"], params["b_out"])

    # ---- MLP block: grid over (batch, seq tiles)
    ts = _seq_tile(T, D)
    n_st = T // ts
    M = params["w_fc1"].shape[1]
    wspec2 = lambda shape: pl.BlockSpec(shape, lambda b, s: (0, 0))
    z = pl.pallas_call(
        _mlp_block_kernel,
        out_shape=jax.ShapeDtypeStruct((B, T, D), x.dtype),
        grid=(B, n_st),
        in_specs=[
            pl.BlockSpec((1, ts, D), lambda b, s: (b, s, 0)),
            wspec2((1, D)), wspec2((1, D)),
            wspec2((D, M)), wspec2((1, M)),
            wspec2((M, D)), wspec2((1, D)),
        ],
        out_specs=pl.BlockSpec((1, ts, D), lambda b, s: (b, s, 0)),
        compiler_params=pltpu.CompilerParams(
            dimension_semantics=("parallel", "parallel"),
            vmem_limit_bytes=vmem_cap),
    )(y, params["ln2_g"], params["ln2_b"], params["w_fc1"], params["b_fc1"],
      params["w_fc2"], params["b_fc2"])
    return z


# --------------------------------------------------------------------------
# Pure-JAX reference (mirrors the PyTorch module, eval mode)
# --------------------------------------------------------------------------
def _reference(x, p, num_heads):
    B, T, D = x.shape
    hd = D // num_heads

    def ln(v, g, b):
        m = jnp.mean(v, axis=-1, keepdims=True)
        var = jnp.mean(jnp.square(v - m), axis=-1, keepdims=True)
        return (v - m) / jnp.sqrt(var + LN_EPS) * g + b

    x2 = ln(x, p["ln1_g"], p["ln1_b"])
    qkv = x2 @ p["w_qkv"] + p["b_qkv"]
    qkv = qkv.reshape(B, T, 3, num_heads, hd).transpose(2, 0, 3, 1, 4)
    q, k, v = qkv[0], qkv[1], qkv[2]
    scores = jnp.einsum("bhqd,bhkd->bhqk", q, k) / math.sqrt(hd)
    attn = jax.nn.softmax(scores, axis=-1)
    out = jnp.einsum("bhqk,bhkd->bhqd", attn, v)
    out = out.transpose(0, 2, 1, 3).reshape(B, T, D)
    x = x + (out @ p["w_out"] + p["b_out"])
    x2 = ln(x, p["ln2_g"], p["ln2_b"])
    h = jnp.maximum(x2 @ p["w_fc1"] + p["b_fc1"], 0.0)
    return x + (h @ p["w_fc2"] + p["b_fc2"])


if __name__ == "__main__":
    B, T, D, H, M = 2, 8, 32, 4, 64   # batch, seq, d_model, heads, mlp_dim

    key = jax.random.PRNGKey(0)
    ks = jax.random.split(key, 12)
    sc = 0.05
    x = jax.random.normal(ks[0], (B, T, D), jnp.float32)
    params = dict(
        ln1_g=1.0 + 0.1 * jax.random.normal(ks[1], (1, D), jnp.float32),
        ln1_b=0.1 * jax.random.normal(ks[2], (1, D), jnp.float32),
        w_qkv=sc * jax.random.normal(ks[3], (D, 3 * D), jnp.float32),
        b_qkv=sc * jax.random.normal(ks[4], (1, 3 * D), jnp.float32),
        w_out=sc * jax.random.normal(ks[5], (D, D), jnp.float32),
        b_out=sc * jax.random.normal(ks[6], (1, D), jnp.float32),
        ln2_g=1.0 + 0.1 * jax.random.normal(ks[7], (1, D), jnp.float32),
        ln2_b=0.1 * jax.random.normal(ks[8], (1, D), jnp.float32),
        w_fc1=sc * jax.random.normal(ks[9], (D, M), jnp.float32),
        b_fc1=sc * jax.random.normal(ks[10], (1, M), jnp.float32),
        w_fc2=sc * jax.random.normal(ks[11], (M, D), jnp.float32),
        b_fc2=jnp.zeros((1, D), jnp.float32),
    )

    out = transformer_encoder_layer_forward(x, params, num_heads=H)
    out = jax.block_until_ready(out)

    with jax.default_matmul_precision("highest"):
        ref = _reference(x, params, H)

    assert out.shape == (B, T, D)
    max_err = float(jnp.max(jnp.abs(out - ref)))
    assert jnp.allclose(out, ref, atol=5e-3, rtol=5e-3), \
        f"mismatch vs reference, max abs err={max_err}"

    print("KERNEL_OK")
</pallas_src>

<mosaic_0001>
module attributes {stable_mosaic.version = 11 : i64} {
  func.func @_attn_block_kernel(%arg0: i32, %arg1: memref<1x8x32xf32, #tpu.memory_space<vmem>>, %arg2: memref<1x32xf32, #tpu.memory_space<vmem>>, %arg3: memref<1x32xf32, #tpu.memory_space<vmem>>, %arg4: memref<32x96xf32, #tpu.memory_space<vmem>>, %arg5: memref<1x96xf32, #tpu.memory_space<vmem>>, %arg6: memref<32x32xf32, #tpu.memory_space<vmem>>, %arg7: memref<1x32xf32, #tpu.memory_space<vmem>>, %arg8: memref<1x8x32xf32, #tpu.memory_space<vmem>>, %arg9: memref<8x32xf32, #tpu.memory_space<vmem>>) attributes {dimension_semantics = [#tpu.dimension_semantics<parallel>], iteration_bounds = array<i64: 2>, scalar_prefetch = 0 : i64, scratch_operands = 1 : i64, tpu.core_type = #tpu.core_type<tc>, window_params = [{transform_indices = @transform_0, window_bounds = array<i64: 1, 8, 32>}, {pipeline_mode = #tpu.pipeline_mode<synchronous>, transform_indices = @transform_1, window_bounds = array<i64: 1, 32>}, {pipeline_mode = #tpu.pipeline_mode<synchronous>, transform_indices = @transform_2, window_bounds = array<i64: 1, 32>}, {pipeline_mode = #tpu.pipeline_mode<synchronous>, transform_indices = @transform_3, window_bounds = array<i64: 32, 96>}, {pipeline_mode = #tpu.pipeline_mode<synchronous>, transform_indices = @transform_4, window_bounds = array<i64: 1, 96>}, {pipeline_mode = #tpu.pipeline_mode<synchronous>, transform_indices = @transform_5, window_bounds = array<i64: 32, 32>}, {pipeline_mode = #tpu.pipeline_mode<synchronous>, transform_indices = @transform_6, window_bounds = array<i64: 1, 32>}, {transform_indices = @transform_7, window_bounds = array<i64: 1, 8, 32>}]} {
    %c0 = arith.constant 0 : index
    %c0_0 = arith.constant 0 : index
    %c0_1 = arith.constant 0 : index
    %0 = vector.load %arg1[%c0, %c0_0, %c0_1] : memref<1x8x32xf32, #tpu.memory_space<vmem>>, vector<1x8x32xf32>
    %1 = vector.shape_cast %0 : vector<1x8x32xf32> to vector<8x32xf32>
    %c0_2 = arith.constant 0 : index
    %c0_3 = arith.constant 0 : index
    %2 = vector.load %arg2[%c0_2, %c0_3] : memref<1x32xf32, #tpu.memory_space<vmem>>, vector<1x32xf32>
    %c0_4 = arith.constant 0 : index
    %c0_5 = arith.constant 0 : index
    %3 = vector.load %arg3[%c0_4, %c0_5] : memref<1x32xf32, #tpu.memory_space<vmem>>, vector<1x32xf32>
    %cst = arith.constant dense<0.000000e+00> : vector<8xf32>
    %4 = vector.multi_reduction <add>, %1, %cst [1] : vector<8x32xf32> to vector<8xf32>
    %5 = vector.shape_cast %4 : vector<8xf32> to vector<8x1xf32>
    %cst_6 = arith.constant 3.200000e+01 : f32
    %6 = vector.broadcast %cst_6 : f32 to vector<8x1xf32>
    %7 = arith.divf %5, %6 : vector<8x1xf32>
    %8 = vector.broadcast %7 : vector<8x1xf32> to vector<8x32xf32>
    %9 = arith.subf %1, %8 : vector<8x32xf32>
    %10 = arith.mulf %9, %9 : vector<8x32xf32>
    %cst_7 = arith.constant dense<0.000000e+00> : vector<8xf32>
    %11 = vector.multi_reduction <add>, %10, %cst_7 [1] : vector<8x32xf32> to vector<8xf32>
    %12 = vector.shape_cast %11 : vector<8xf32> to vector<8x1xf32>
    %cst_8 = arith.constant 3.200000e+01 : f32
    %13 = vector.broadcast %cst_8 : f32 to vector<8x1xf32>
    %14 = arith.divf %12, %13 : vector<8x1xf32>
    %15 = vector.broadcast %7 : vector<8x1xf32> to vector<8x32xf32>
    %16 = arith.subf %1, %15 : vector<8x32xf32>
    %cst_9 = arith.constant 9.99999974E-6 : f32
    %17 = vector.broadcast %cst_9 : f32 to vector<8x1xf32>
    %18 = arith.addf %14, %17 : vector<8x1xf32>
    %19 = math.rsqrt %18 : vector<8x1xf32>
    %20 = vector.broadcast %19 : vector<8x1xf32> to vector<8x32xf32>
    %21 = arith.mulf %16, %20 : vector<8x32xf32>
    %22 = vector.broadcast %2 : vector<1x32xf32> to vector<8x32xf32>
    %23 = arith.mulf %21, %22 : vector<8x32xf32>
    %24 = vector.broadcast %3 : vector<1x32xf32> to vector<8x32xf32>
    %25 = arith.addf %23, %24 : vector<8x32xf32>
    %c0_10 = arith.constant 0 : index
    %c0_11 = arith.constant 0 : index
    %26 = vector.load %arg4[%c0_10, %c0_11] : memref<32x96xf32, #tpu.memory_space<vmem>>, vector<32x96xf32>
    %cst_12 = arith.constant dense<0.000000e+00> : vector<8x96xf32>
    %27 = tpu.matmul %25, %26, %cst_12 {dimension_numbers = #tpu.dot_dimension_numbers<[1], [0], [0], [1], [0, 0, 1, 1], [], []>} : vector<8x32xf32>, vector<32x96xf32>, vector<8x96xf32> -> vector<8x96xf32>
    %c0_13 = arith.constant 0 : index
    %c0_14 = arith.constant 0 : index
    %28 = vector.load %arg5[%c0_13, %c0_14] : memref<1x96xf32, #tpu.memory_space<vmem>>, vector<1x96xf32>
    %29 = vector.broadcast %28 : vector<1x96xf32> to vector<8x96xf32>
    %30 = arith.addf %27, %29 : vector<8x96xf32>
    %31 = vector.extract_strided_slice %30 {offsets = [0, 0], sizes = [8, 8], strides = [1, 1]} : vector<8x96xf32> to vector<8x8xf32>
    %32 = vector.extract_strided_slice %30 {offsets = [0, 32], sizes = [8, 8], strides = [1, 1]} : vector<8x96xf32> to vector<8x8xf32>
    %33 = vector.extract_strided_slice %30 {offsets = [0, 64], sizes = [8, 8], strides = [1, 1]} : vector<8x96xf32> to vector<8x8xf32>
    %34 = tpu.transpose %32, [1, 0] : vector<8x8xf32> -> vector<8x8xf32>
    %cst_15 = arith.constant dense<0.000000e+00> : vector<8x8xf32>
    %35 = tpu.matmul %31, %34, %cst_15 {dimension_numbers = #tpu.dot_dimension_numbers<[1], [0], [0], [1], [0, 0, 1, 1], [], []>} : vector<8x8xf32>, vector<8x8xf32>, vector<8x8xf32> -> vector<8x8xf32>
    %cst_16 = arith.constant 0.353553385 : f32
    %36 = vector.broadcast %cst_16 : f32 to vector<8x8xf32>
    %37 = arith.mulf %35, %36 : vector<8x8xf32>
    %cst_17 = arith.constant dense<0xFF800000> : vector<8xf32>
    %38 = vector.multi_reduction <maximumf>, %37, %cst_17 [1] : vector<8x8xf32> to vector<8xf32>
    %39 = vector.shape_cast %38 : vector<8xf32> to vector<8x1xf32>
    %40 = vector.broadcast %39 : vector<8x1xf32> to vector<8x8xf32>
    %41 = arith.subf %37, %40 : vector<8x8xf32>
    %42 = math.exp %41 : vector<8x8xf32>
    %cst_18 = arith.constant dense<0.000000e+00> : vector<8xf32>
    %43 = vector.multi_reduction <add>, %42, %cst_18 [1] : vector<8x8xf32> to vector<8xf32>
    %44 = vector.shape_cast %43 : vector<8xf32> to vector<8x1xf32>
    %45 = vector.broadcast %44 : vector<8x1xf32> to vector<8x8xf32>
    %46 = arith.divf %42, %45 : vector<8x8xf32>
    %cst_19 = arith.constant dense<0.000000e+00> : vector<8x8xf32>
    %47 = tpu.matmul %46, %33, %cst_19 {dimension_numbers = #tpu.dot_dimension_numbers<[1], [0], [0], [1], [0, 0, 1, 1], [], []>} : vector<8x8xf32>, vector<8x8xf32>, vector<8x8xf32> -> vector<8x8xf32>
    %c0_20 = arith.constant 0 : index
    %c0_21 = arith.constant 0 : index
    %48 = vector.load %arg9[%c0_20, %c0_21] : memref<8x32xf32, #tpu.memory_space<vmem>>, vector<8x8xf32>
    tpu.vector_store %arg9[%c0_20, %c0_21], %47 {strides = array<i32>} : memref<8x32xf32, #tpu.memory_space<vmem>>, vector<8x8xf32>,
    %49 = vector.extract_strided_slice %30 {offsets = [0, 8], sizes = [8, 8], strides = [1, 1]} : vector<8x96xf32> to vector<8x8xf32>
    %50 = vector.extract_strided_slice %30 {offsets = [0, 40], sizes = [8, 8], strides = [1, 1]} : vector<8x96xf32> to vector<8x8xf32>
    %51 = vector.extract_strided_slice %30 {offsets = [0, 72], sizes = [8, 8], strides = [1, 1]} : vector<8x96xf32> to vector<8x8xf32>
    %52 = tpu.transpose %50, [1, 0] : vector<8x8xf32> -> vector<8x8xf32>
    %cst_22 = arith.constant dense<0.000000e+00> : vector<8x8xf32>
    %53 = tpu.matmul %49, %52, %cst_22 {dimension_numbers = #tpu.dot_dimension_numbers<[1], [0], [0], [1], [0, 0, 1, 1], [], []>} : vector<8x8xf32>, vector<8x8xf32>, vector<8x8xf32> -> vector<8x8xf32>
    %cst_23 = arith.constant 0.353553385 : f32
    %54 = vector.broadcast %cst_23 : f32 to vector<8x8xf32>
    %55 = arith.mulf %53, %54 : vector<8x8xf32>
    %cst_24 = arith.constant dense<0xFF800000> : vector<8xf32>
    %56 = vector.multi_reduction <maximumf>, %55, %cst_24 [1] : vector<8x8xf32> to vector<8xf32>
    %57 = vector.shape_cast %56 : vector<8xf32> to vector<8x1xf32>
    %58 = vector.broadcast %57 : vector<8x1xf32> to vector<8x8xf32>
    %59 = arith.subf %55, %58 : vector<8x8xf32>
    %60 = math.exp %59 : vector<8x8xf32>
    %cst_25 = arith.constant dense<0.000000e+00> : vector<8xf32>
    %61 = vector.multi_reduction <add>, %60, %cst_25 [1] : vector<8x8xf32> to vector<8xf32>
    %62 = vector.shape_cast %61 : vector<8xf32> to vector<8x1xf32>
    %63 = vector.broadcast %62 : vector<8x1xf32> to vector<8x8xf32>
    %64 = arith.divf %60, %63 : vector<8x8xf32>
    %cst_26 = arith.constant dense<0.000000e+00> : vector<8x8xf32>
    %65 = tpu.matmul %64, %51, %cst_26 {dimension_numbers = #tpu.dot_dimension_numbers<[1], [0], [0], [1], [0, 0, 1, 1], [], []>} : vector<8x8xf32>, vector<8x8xf32>, vector<8x8xf32> -> vector<8x8xf32>
    %c0_27 = arith.constant 0 : index
    %c8 = arith.constant 8 : index
    %66 = vector.load %arg9[%c0_27, %c8] : memref<8x32xf32, #tpu.memory_space<vmem>>, vector<8x8xf32>
    tpu.vector_store %arg9[%c0_27, %c8], %65 {strides = array<i32>} : memref<8x32xf32, #tpu.memory_space<vmem>>, vector<8x8xf32>,
    %67 = vector.extract_strided_slice %30 {offsets = [0, 16], sizes = [8, 8], strides = [1, 1]} : vector<8x96xf32> to vector<8x8xf32>
    %68 = vector.extract_strided_slice %30 {offsets = [0, 48], sizes = [8, 8], strides = [1, 1]} : vector<8x96xf32> to vector<8x8xf32>
    %69 = vector.extract_strided_slice %30 {offsets = [0, 80], sizes = [8, 8], strides = [1, 1]} : vector<8x96xf32> to vector<8x8xf32>
    %70 = tpu.transpose %68, [1, 0] : vector<8x8xf32> -> vector<8x8xf32>
    %cst_28 = arith.constant dense<0.000000e+00> : vector<8x8xf32>
    %71 = tpu.matmul %67, %70, %cst_28 {dimension_numbers = #tpu.dot_dimension_numbers<[1], [0], [0], [1], [0, 0, 1, 1], [], []>} : vector<8x8xf32>, vector<8x8xf32>, vector<8x8xf32> -> vector<8x8xf32>
    %cst_29 = arith.constant 0.353553385 : f32
    %72 = vector.broadcast %cst_29 : f32 to vector<8x8xf32>
    %73 = arith.mulf %71, %72 : vector<8x8xf32>
    %cst_30 = arith.constant dense<0xFF800000> : vector<8xf32>
    %74 = vector.multi_reduction <maximumf>, %73, %cst_30 [1] : vector<8x8xf32> to vector<8xf32>
    %75 = vector.shape_cast %74 : vector<8xf32> to vector<8x1xf32>
    %76 = vector.broadcast %75 : vector<8x1xf32> to vector<8x8xf32>
    %77 = arith.subf %73, %76 : vector<8x8xf32>
    %78 = math.exp %77 : vector<8x8xf32>
    %cst_31 = arith.constant dense<0.000000e+00> : vector<8xf32>
    %79 = vector.multi_reduction <add>, %78, %cst_31 [1] : vector<8x8xf32> to vector<8xf32>
    %80 = vector.shape_cast %79 : vector<8xf32> to vector<8x1xf32>
    %81 = vector.broadcast %80 : vector<8x1xf32> to vector<8x8xf32>
    %82 = arith.divf %78, %81 : vector<8x8xf32>
    %cst_32 = arith.constant dense<0.000000e+00> : vector<8x8xf32>
    %83 = tpu.matmul %82, %69, %cst_32 {dimension_numbers = #tpu.dot_dimension_numbers<[1], [0], [0], [1], [0, 0, 1, 1], [], []>} : vector<8x8xf32>, vector<8x8xf32>, vector<8x8xf32> -> vector<8x8xf32>
    %c0_33 = arith.constant 0 : index
    %c16 = arith.constant 16 : index
    %84 = vector.load %arg9[%c0_33, %c16] : memref<8x32xf32, #tpu.memory_space<vmem>>, vector<8x8xf32>
    tpu.vector_store %arg9[%c0_33, %c16], %83 {strides = array<i32>} : memref<8x32xf32, #tpu.memory_space<vmem>>, vector<8x8xf32>,
    %85 = vector.extract_strided_slice %30 {offsets = [0, 24], sizes = [8, 8], strides = [1, 1]} : vector<8x96xf32> to vector<8x8xf32>
    %86 = vector.extract_strided_slice %30 {offsets = [0, 56], sizes = [8, 8], strides = [1, 1]} : vector<8x96xf32> to vector<8x8xf32>
    %87 = vector.extract_strided_slice %30 {offsets = [0, 88], sizes = [8, 8], strides = [1, 1]} : vector<8x96xf32> to vector<8x8xf32>
    %88 = tpu.transpose %86, [1, 0] : vector<8x8xf32> -> vector<8x8xf32>
    %cst_34 = arith.constant dense<0.000000e+00> : vector<8x8xf32>
    %89 = tpu.matmul %85, %88, %cst_34 {dimension_numbers = #tpu.dot_dimension_numbers<[1], [0], [0], [1], [0, 0, 1, 1], [], []>} : vector<8x8xf32>, vector<8x8xf32>, vector<8x8xf32> -> vector<8x8xf32>
    %cst_35 = arith.constant 0.353553385 : f32
    %90 = vector.broadcast %cst_35 : f32 to vector<8x8xf32>
    %91 = arith.mulf %89, %90 : vector<8x8xf32>
    %cst_36 = arith.constant dense<0xFF800000> : vector<8xf32>
    %92 = vector.multi_reduction <maximumf>, %91, %cst_36 [1] : vector<8x8xf32> to vector<8xf32>
    %93 = vector.shape_cast %92 : vector<8xf32> to vector<8x1xf32>
    %94 = vector.broadcast %93 : vector<8x1xf32> to vector<8x8xf32>
    %95 = arith.subf %91, %94 : vector<8x8xf32>
    %96 = math.exp %95 : vector<8x8xf32>
    %cst_37 = arith.constant dense<0.000000e+00> : vector<8xf32>
    %97 = vector.multi_reduction <add>, %96, %cst_37 [1] : vector<8x8xf32> to vector<8xf32>
    %98 = vector.shape_cast %97 : vector<8xf32> to vector<8x1xf32>
    %99 = vector.broadcast %98 : vector<8x1xf32> to vector<8x8xf32>
    %100 = arith.divf %96, %99 : vector<8x8xf32>
    %cst_38 = arith.constant dense<0.000000e+00> : vector<8x8xf32>
    %101 = tpu.matmul %100, %87, %cst_38 {dimension_numbers = #tpu.dot_dimension_numbers<[1], [0], [0], [1], [0, 0, 1, 1], [], []>} : vector<8x8xf32>, vector<8x8xf32>, vector<8x8xf32> -> vector<8x8xf32>
    %c0_39 = arith.constant 0 : index
    %c24 = arith.constant 24 : index
    %102 = vector.load %arg9[%c0_39, %c24] : memref<8x32xf32, #tpu.memory_space<vmem>>, vector<8x8xf32>
    tpu.vector_store %arg9[%c0_39, %c24], %101 {strides = array<i32>} : memref<8x32xf32, #tpu.memory_space<vmem>>, vector<8x8xf32>,
    %c0_40 = arith.constant 0 : index
    %c0_41 = arith.constant 0 : index
    %103 = vector.load %arg9[%c0_40, %c0_41] : memref<8x32xf32, #tpu.memory_space<vmem>>, vector<8x32xf32>
    %c0_42 = arith.constant 0 : index
    %c0_43 = arith.constant 0 : index
    %104 = vector.load %arg6[%c0_42, %c0_43] : memref<32x32xf32, #tpu.memory_space<vmem>>, vector<32x32xf32>
    %cst_44 = arith.constant dense<0.000000e+00> : vector<8x32xf32>
    %105 = tpu.matmul %103, %104, %cst_44 {dimension_numbers = #tpu.dot_dimension_numbers<[1], [0], [0], [1], [0, 0, 1, 1], [], []>} : vector<8x32xf32>, vector<32x32xf32>, vector<8x32xf32> -> vector<8x32xf32>
    %c0_45 = arith.constant 0 : index
    %c0_46 = arith.constant 0 : index
    %106 = vector.load %arg7[%c0_45, %c0_46] : memref<1x32xf32, #tpu.memory_space<vmem>>, vector<1x32xf32>
    %107 = vector.broadcast %106 : vector<1x32xf32> to vector<8x32xf32>
    %108 = arith.addf %105, %107 : vector<8x32xf32>
    %109 = arith.addf %1, %108 : vector<8x32xf32>
    %c0_47 = arith.constant 0 : index
    %c0_48 = arith.constant 0 : index
    %c0_49 = arith.constant 0 : index
    %110 = vector.load %arg8[%c0_47, %c0_48, %c0_49] : memref<1x8x32xf32, #tpu.memory_space<vmem>>, vector<1x8x32xf32>
    %111 = vector.shape_cast %110 : vector<1x8x32xf32> to vector<8x32xf32>
    %112 = vector.shape_cast %109 : vector<8x32xf32> to vector<1x8x32xf32>
    tpu.vector_store %arg8[%c0_47, %c0_48, %c0_49], %112 {strides = array<i32>} : memref<1x8x32xf32, #tpu.memory_space<vmem>>, vector<1x8x32xf32>,
    return
  }
  func.func @transform_0(%arg0: i32) -> (i32, i32, i32) {
    %c0_i32 = arith.constant 0 : i32
    %c0_i32_0 = arith.constant 0 : i32
    %c0_i32_1 = arith.constant 0 : i32
    return %arg0, %c0_i32, %c0_i32_0 : i32, i32, i32
  }
  func.func @transform_1(%arg0: i32) -> (i32, i32) {
    %c0_i32 = arith.constant 0 : i32
    %c0_i32_0 = arith.constant 0 : i32
    %c0_i32_1 = arith.constant 0 : i32
    return %c0_i32, %c0_i32_0 : i32, i32
  }
  func.func @transform_2(%arg0: i32) -> (i32, i32) {
    %c0_i32 = arith.constant 0 : i32
    %c0_i32_0 = arith.constant 0 : i32
    %c0_i32_1 = arith.constant 0 : i32
    return %c0_i32, %c0_i32_0 : i32, i32
  }
  func.func @transform_3(%arg0: i32) -> (i32, i32) {
    %c0_i32 = arith.constant 0 : i32
    %c0_i32_0 = arith.constant 0 : i32
    %c0_i32_1 = arith.constant 0 : i32
    return %c0_i32, %c0_i32_0 : i32, i32
  }
  func.func @transform_4(%arg0: i32) -> (i32, i32) {
    %c0_i32 = arith.constant 0 : i32
    %c0_i32_0 = arith.constant 0 : i32
    %c0_i32_1 = arith.constant 0 : i32
    return %c0_i32, %c0_i32_0 : i32, i32
  }
  func.func @transform_5(%arg0: i32) -> (i32, i32) {
    %c0_i32 = arith.constant 0 : i32
    %c0_i32_0 = arith.constant 0 : i32
    %c0_i32_1 = arith.constant 0 : i32
    return %c0_i32, %c0_i32_0 : i32, i32
  }
  func.func @transform_6(%arg0: i32) -> (i32, i32) {
    %c0_i32 = arith.constant 0 : i32
    %c0_i32_0 = arith.constant 0 : i32
    %c0_i32_1 = arith.constant 0 : i32
    return %c0_i32, %c0_i32_0 : i32, i32
  }
  func.func @transform_7(%arg0: i32) -> (i32, i32, i32) {
    %c0_i32 = arith.constant 0 : i32
    %c0_i32_0 = arith.constant 0 : i32
    %c0_i32_1 = arith.constant 0 : i32
    return %arg0, %c0_i32, %c0_i32_0 : i32, i32, i32
  }
}

</mosaic_0001>

<bundles_post_ra>
// kernel: tpu_custom_call.1
= control target key start
LH: loop header
LB: loop body
LE: loop exit
PB: predicated region body
PF: predicated region fallthrough
CT: control target
= control target key end

     0   :  { %s1540_s0 = inlined_call_operand.hbm [shape: f32[2,8,32], index: 0, kind: input, shape index: {}]   ;;  %s1541_s1 = inlined_call_operand.hbm [shape: f32[1,32], index: 1, kind: input, shape index: {}]   ;;  %s1542_s2 = inlined_call_operand.vmem [shape: f32[1,32], index: 2, kind: input, shape index: {}]   ;;  %s1543_s3 = inlined_call_operand.hbm [shape: f32[32,96], index: 3, kind: input, shape index: {}]   ;;  %s1544_s4 = inlined_call_operand.vmem [shape: f32[1,96], index: 4, kind: input, shape index: {}]   ;;  %s1545_s5 = inlined_call_operand.hbm [shape: f32[32,32], index: 5, kind: input, shape index: {}]   ;;  %s1546_s6 = inlined_call_operand.vmem [shape: f32[1,32], index: 6, kind: input, shape index: {}]   ;;  %s1547_s7 = inlined_call_operand.hbm [shape: f32[2,8,32], index: 7, kind: output, shape index: {}]  }
   0x1   :  { %1548 = sst [smem:[#allocation16_spill]] %s1541_s1 }
   0x2   :  { %12 = vsyncpa [#allocation4], 0 }
   0x3   :  { %14 = vsyncpa [#allocation4 + $0x1], 0 }
   0x4   :  { %15 = vsyncpa [#allocation7], 0 }
   0x5   :  { %16 = vsyncpa [#allocation10], 0 }
   0x6   :  { %17 = vsyncpa [#allocation5], 0 }
   0x7   :  { %19 = vsyncpa [#allocation5 + $0x1], 0  ;;  %s1306_s24 = smov 0   ;;  %s1308_s25 = smov 0  }
   0x8   :  { %s1310_s26 = smov 0   ;;  %s1312_s27 = smov 0  }
   0x9 LB: > { %s1327_s28 = sadd.s32 4294967295, %s1244_s27   ;;  %s900_s29 = sadd.s32 4294967294, %s1244_s27   ;;  %s1244_s27 = sphi %s1312_s27, %s1562_s27   ;;  %s1240_s26 = sphi %s1310_s26, %s1561_s26   ;;  %s1236_s25 = sphi %s1308_s25, %s1560_s25   ;;  %s1232_s24 = sphi %s1306_s24, %s1559_s24  }
   0xa   : > { %p45_p0 = scmp.ne.s32.totalorder %s1236_s25, %s1232_s24  ;;  %p46_p1 = scmp.eq.s32.totalorder %s1327_s28, 0 }
   0xb   : > { %p195_p2 = scmp.eq.s32.totalorder %s1327_s28, 1  ;;  %p201_p3 = scmp.eq.s32.totalorder %s900_s29, 1 }
   0xc   : > { %p1336_p4 = por %p46_p1, %p45_p0  ;;  %p901_p5 = scmp.ge.s32.totalorder %s1244_s27, 1 }
   0xd   : > { %p1341_p6 = por %p201_p3, %p45_p0  ;;  %p208_p7 = scmp.lt.s32.totalorder %s1244_s27, 3 }
   0xe   : > { %s1551_s1 = sld [smem:[#allocation16_spill]]  ;;  %s1246_s13 = smov [#allocation6]  }
   0xf   : > { %p1349_p8 = pnand %p901_p5, %p208_p7  ;;  %s222_s14 = sshll.u32 %s1246_s13, 4  ;;  %s223_s14 = int_to_ptr.vmem [resolvable:$true] %s222_s14 }
  0x10   : > { %s234_s17 = sshll.u32 %s1543_s3, 4  ;;  %s1247_s19 = smov [#allocation8]   ;;  %s235_s17 = int_to_ptr.hbm [resolvable:$true] %s234_s17 }
  0x11   : > { %p948_p10 = pneg %p1349_p8  ;;  %s236_s20 = sshll.u32 %s1247_s19, 4  ;;  %s237_s20 = int_to_ptr.vmem [resolvable:$true] %s236_s20 }
  0x12   : > { %s1248_s21 = smov 128   ;;  %s1249_s22 = smov 8  }
  0x13   : > { %p1361_p11 = pnand %p948_p10, %p46_p1  ;;  %s251_s9 = sshll.u32 %s1545_s5, 4  ;;  %s252_s9 = int_to_ptr.hbm [resolvable:$true] %s251_s9 }
  0x14   : > { %s220_s11 = sshll.u32 %s1551_s1, 4  ;;  %s1250_s10 = smov [#allocation9]   ;;  %s221_s11 = int_to_ptr.hbm [resolvable:$true] %s220_s11 }
  0x15   : > { %951 = dma.hbm_to_vmem [thread:$0]  (!%p1361_p11), %s221_s11, 16, %s223_s14, [#allocation7]  }
  0x16   : > { %954 = dma.hbm_to_vmem [thread:$0]  (!%p1361_p11), %s235_s17, 512, %s237_s20, [#allocation7], %s1248_s21, %s1248_s21, %s1249_s22  }
  0x17   : > { %s253_s13 = sshll.u32 %s1250_s10, 4  ;;  %s1375_s11 = sadd.s32 1, %s1244_s27   ;;  %s254_s13 = int_to_ptr.vmem [resolvable:$true] %s253_s13 }
  0x18   : > { %957 = dma.hbm_to_vmem [thread:$0]  (!%p1361_p11), %s252_s9, 512, %s254_s13, [#allocation10], %s1248_s21, %s1248_s21, %s1249_s22  }
  0x19   : > { %s29_s14 = ssub.s32 %s1244_s27, %s1375_s11  ;;  %s32_s15 = sadd.s32 1, %s1240_s26 }
  0x1a   : > { %p30_p12 = scmp.eq.s32.totalorder %s29_s14, 0  ;;  %p39_p13 = scmp.ne.s32.totalorder %s1240_s26, %s1236_s25 }
  0x1b   : > { %p40_p0 = scmp.eq.s32.totalorder %s1244_s27, 0  ;;  %p969_p5 = scmp.lt.s32.totalorder %s1244_s27, 2 }
  0x1c   : > { %s1384_s16 = scalar_select %p30_p12, %s1240_s26, %s32_s15  }
  0x1d   : > { %p1388_p3 = por %p195_p2, %p39_p13  ;;  %s270_s19 = sand.u32 1, %s1240_s26  }
  0x1e   : > { %s907_s20 = sshll.u32 %s1244_s27, 3  ;;  %p41_p7 = por %p40_p0, %p39_p13 }
  0x1f   : > { %s906_s18 = sshll.u32 %s270_s19, 3  ;;  %s278_s23 = scalar_lea.hbm %s1540_s0, %s907_s20 }
  0x20   : > { %s280_s29 = sshll.u32 %s278_s23, 4  ;;  %s274_s9 = scalar_lea.vmem [#allocation3], %s906_s18  ;;  %s281_s29 = int_to_ptr.hbm [resolvable:$true] %s280_s29 }
  0x21   : > { %s282_s10 = sshll.u32 %s274_s9, 4  ;;  %p1398_p10 = pnand %p969_p5, %p41_p7  ;;  %s283_s10 = int_to_ptr.vmem [resolvable:$true] %s282_s10 }
  0x22   : > { %s271_s14 = scalar_lea.sflag [#allocation4], %s270_s19  ;;  %s1140_s15 = sshra.s32 %s281_s29, 4  ;;  %s1141_s15 = int_to_ptr.hbm [resolvable:$true] %s1140_s15 }
  0x23   : > { %s1142_s1 = scalar_lea.hbm %s1141_s15, 8  ;;  %p1144_p11 = pneg %p1398_p10 }
  0x24   : > { %p1143_p2 = scmp.ne.s32.totalorder %s1141_s15, %s1142_s1  ;;  %s1147_s18 = scalar_lea.hbm %s1540_s0, 16 }
  0x25   : > { %p1148_p0 = scmp.lt.s32.totalorder %s1141_s15, %s1540_s0  ;;  %p1149_p5 = scmp.lt.s32.totalorder %s1147_s18, %s1142_s1 }
  0x26   : > { %p1145_p12 = pnand %p1144_p11, %p1143_p2 }
  0x27   : > { %p1150_p7 = por %p1149_p5, %p1148_p0 }
  0x28   : > { %p1146_p13 = pneg %p1145_p12 }
  0x2a   : > { %p1151_p9 = pnand %p1150_p7, %p1146_p13 }
  0x2c   : > { %1154 = shalt.err (!%p1151_p9)
}
  0x2d   : > { %961 = dma.hbm_to_vmem [thread:$0]  (!%p1398_p10), %s281_s29, 128, %s283_s10, %s271_s14  }
  0x2e   : > { %291 = sbr.rel (%p1349_p8) target bundleno = 1376 (0x560), region = 48  ;;  %s1415_s19 = sand.u32 (!%p1349_p8), 1, %s1236_s25  }
  0x2f   : > { %s909_s9 = sshll.u32 (!%p1349_p8), %s1415_s19, 3  ;;  %s294_s20 = scalar_lea.sflag (!%p1349_p8), [#allocation4], %s1415_s19 }
  0x30   : > { %s297_s1 = scalar_lea.vmem (!%p1349_p8), [#allocation3], %s909_s9 }
  0x33   : > { %1215 = dma.done.wait (%p1336_p4), %s294_s20, 128  }
  0x34   : > { %1217 = vsyncadd (%p1336_p4), %s294_s20, 4294967168 }
  0x35   : > { %1219 = dma.done.wait (%p46_p1), [#allocation7], 528  }
  0x36   : > { %1221 = vsyncadd (%p46_p1), [#allocation7], 4294966768 }
  0x37   : > { %1223 = dma.done.wait (%p46_p1), [#allocation10], 512  }
  0x38   : > { %1225 = vsyncadd (%p46_p1), [#allocation10], 4294966784  ;;  %vm347_vm0 = vcmask 261120   ;;  %v1433_v0 = vld [vmem:[%s297_s1] sm:$0xff]  ;;  %v1251_v2 = vmov 32.0   ;;  %v385_v17 = vld [vmem:[#allocation8] sm:$0xff] }
  0x39   : > { %v348_v1 = vsel %vm347_vm0, %v1433_v0, 0.0  ;;  %1030 = vrcp.f32 %v1251_v2  ;;  %v388_v14 = vld [vmem:[#allocation8 + $0x18] sm:$0xff]  ;;  %v387_v15 = vld [vmem:[#allocation8 + $0x10] sm:$0xff]  ;;  %v386_v16 = vld [vmem:[#allocation8 + $0x8] sm:$0xff]  ;;  %s1252_s13 = smov 72   ;;  %s1253_s14 = smov 120  }
  0x3a   : > { %349 = vadd.xlane.f32.xlu0 %v348_v1  ;;  %408 = vmatpush.msra.mxu0 %v388_v14  ;;  %v1026_v27 = vld [vmem:[#allocation6] ss:$0 sm:$0xff]  ;;  %v1027_v30 = vld [vmem:[%s1542_s2] ss:$0 sm:$0xff]  ;;  %s1254_s15 = smov 96   ;;  %s1255_s21 = smov 80  }
  0x3b   : > { %v1028_v33 = vld [vmem:[%s1544_s4] ss:$0 sm:$0xff]  ;;  %s1256_s18 = smov 88   ;;  %s1257_s22 = smov 104   ;;  %vm419_vm5 = vcmask 64512  }
  0x3c   : > { %409 = vmatpush.msra.mxu0 %v387_v15  ;;  %s1258_s23 = smov 112   ;;  %s1259_s20 = smov 64  }
  0x3d   : > { %s1260_s1 = smov 40   ;;  %s1261_s30 = smov 56  }
  0x3e   : > { %410 = vmatpush.msra.mxu0 %v386_v16  ;;  %s1262_s12 = smov 48   ;;  %s1263_s29 = smov 8  }
  0x3f   : > { %v1031_v3 = vpop.eup %1030  ;;  %s1264_s10 = smov 16  }
  0x40   : > { %v352_v4 = vmul.f32 32.0, %v1031_v3  ;;  %vm356_vm1 = vweird.f32 %v1031_v3  ;;  %411 = vmatpush.msra.mxu0 %v385_v17 }
  0x42   : > { %v353_v5 = vsub.f32 1.0, %v352_v4 }
  0x44   : > { %v354_v6 = vmul.f32 %v1031_v3, %v353_v5 }
  0x46   : > { %v355_v7 = vadd.f32 %v1031_v3, %v354_v6 }
  0x48   : > { %v357_v8 = vsel %vm356_vm1, %v1031_v3, %v355_v7 }
  0xad   : > { %v350_v9 = vpop.xlane.xlu0 %349 }
  0xae   : > { %v358_v10 = vmul.f32 %v357_v8, %v350_v9 }
  0xb0   : > { %v359_v11 = vsub.f32 %v1433_v0, %v358_v10 }
  0xb2   : > { %v360_v12 = vmul.f32 %v359_v11, %v359_v11 }
  0xb4   : > { %v361_v13 = vsel %vm347_vm0, %v360_v12, 0.0 }
  0xb5   : > { %362 = vadd.xlane.f32.xlu0 %v361_v13 }
 0x128   : > { %v363_v18 = vpop.xlane.xlu0 %362 }
 0x129   : > { %v364_v19 = vmul.f32 %v363_v18, %v357_v8 }
 0x12b   : > { %v365_v20 = vadd.f32 1e-05, %v364_v19 }
 0x12d   : > { %1032 = vrsqrt.f32 %v365_v20  ;;  %vm372_vm3 = vweird.f32 %v365_v20 }
 0x133   : > { %v1033_v21 = vpop.eup %1032 }
 0x134   : > { %v367_v22 = vmul.f32 %v1033_v21, %v365_v20  ;;  %vm373_vm2 = vweird.f32 %v1033_v21 }
 0x135   : > { %vm374_vm4 = vmor %vm372_vm3, %vm373_vm2 }
 0x136   : > { %v368_v23 = vmul.f32 %v1033_v21, %v367_v22 }
 0x138   : > { %v369_v24 = vmul.f32 0.5, %v368_v23 }
 0x13a   : > { %v370_v25 = vsub.f32 1.5, %v369_v24 }
 0x13c   : > { %v371_v26 = vmul.f32 %v1033_v21, %v370_v25 }
 0x13e   : > { %v375_v28 = vsel %vm374_vm4, %v1033_v21, %v371_v26 }
 0x13f   : > { %v376_v29 = vmul.f32 %v375_v28, %v359_v11 }
 0x141   : > { %v380_v31 = vmul.f32 %v1026_v27, %v376_v29 }
 0x143   : > { %v384_v32 = vadd.f32 %v1027_v30, %v380_v31 }
 0x145   : > { %914 = vmatmul.msk.f32.vlgmr.msra.gmra.mxu0 %vm347_vm0, %v384_v32 }
 0x1c2   : > { %v413_v34 = vpop.f32.mrf.mxu0 }
 0x1c3   : > { %v1446_v35 = vadd.f32 %v1028_v33, %v413_v34 }
 0x1c5   : > { %668 = vrot.lane.b32.xlu0 %v1446_v35, %s1252_s13  ;;  %496 = vrot.lane.b32.xlu2 %v1446_v35, %s1253_s14  ;;  %s1265_s13 = smov 24   ;;  %s929_s14 = sshll.u32 %s1327_s28, 3 }
 0x1c6   : > { %417 = vrot.lane.b32.xlu1 %v1446_v35, %s1254_s15  ;;  %s786_s28 = scalar_lea.sflag [#allocation5], %s1415_s19 }
 0x1cd   : > { %583 = vrot.lane.b32.xlu2 %v1446_v35, %s1255_s21 }
 0x1ce   : > { %498 = vrot.lane.b32.xlu1 %v1446_v35, %s1256_s18 }
 0x1d5   : > { %666 = vrot.lane.b32.xlu2 %v1446_v35, %s1257_s22 }
 0x1d6   : > { %581 = vrot.lane.b32.xlu1 %v1446_v35, %s1258_s23  ;;  %s796_s23 = scalar_lea.hbm %s1547_s7, %s929_s14 }
 0x21f   : > { %v497_v36 = vpop.permute.xlu2 %496 }
 0x227   : > { %v584_v37 = vpop.permute.xlu2 %583 }
 0x22f   : > { %v667_v40 = vpop.permute.xlu2 %666 }
 0x237   : > { %v669_v38 = vpop.permute.xlu0 %668 }
 0x238   : > { %v418_v39 = vpop.permute.xlu1 %417  ;;  %924 = vmatpush.xpose.msk.msrb.mxu0 %vm419_vm5, %v669_v38 }
 0x239   : > { %915 = vmatpush.xpose.msk.msra.mxu1 %vm419_vm5, %v418_v39 }
 0x23b   : > { %925 = vmatmul.msk.f32.vlgmr.msrb.gmra.mxu0 %vm419_vm5, %v667_v40 }
 0x23c   : > { %916 = vmatmul.msk.f32.vlgmr.msra.gmra.mxu1 %vm419_vm5, %v1446_v35 }
 0x23d   : > { %921 = vmatpush.xpose.msk.msrb.mxu1 %vm419_vm5, %v584_v37 }
 0x240   : > { %v499_v41 = vpop.permute.xlu1 %498 }
 0x241   : > { %918 = vmatpush.xpose.msk.msra.mxu3 %vm419_vm5, %v499_v41 }
 0x244   : > { %919 = vmatmul.msk.f32.vlgmr.msra.gmra.mxu3 %vm419_vm5, %v497_v36 }
 0x248   : > { %v582_v42 = vpop.permute.xlu1 %581 }
 0x249   : > { %922 = vmatmul.msk.f32.vlgmr.msrb.gmra.mxu1 %vm419_vm5, %v582_v42 }
 0x2b8   : > { %v691_v52 = vpop.f32.mrf.mxu0 }
 0x2b9   : > { %v441_v43 = vpop.f32.mrf.mxu1  ;;  %v694_v53 = vmul.f32 0.35355338, %v691_v52 }
 0x2ba   : > { %v444_v44 = vmul.f32 0.35355338, %v441_v43 }
 0x2bb   : > { %v695_v54 = vsel %vm419_vm5, %v694_v53, -inf }
 0x2bc   : > { %v445_v45 = vsel %vm419_vm5, %v444_v44, -inf }
 0x2bd   : > { %446 = vmax.xlane.f32.xlu1 %v445_v45 }
 0x2c6   : > { %v606_v46 = vpop.f32.mrf.mxu1 }
 0x2c7   : > { %v609_v47 = vmul.f32 0.35355338, %v606_v46  ;;  %v521_v48 = vpop.f32.mrf.mxu3 }
 0x2c8   : > { %v524_v49 = vmul.f32 0.35355338, %v521_v48 }
 0x2c9   : > { %v610_v50 = vsel %vm419_vm5, %v609_v47, -inf }
 0x2ca   : > { %611 = vmax.xlane.f32.xlu0 %v610_v50  ;;  %v525_v51 = vsel %vm419_vm5, %v524_v49, -inf }
 0x2cb   : > { %526 = vmax.xlane.f32.xlu2 %v525_v51 }
 0x2d3   : > { %696 = vmax.xlane.f32.xlu2 %v695_v54 }
 0x2eb   : > { %469 = vrot.lane.b32.xlu2 %v1446_v35, %s1259_s20  ;;  %s343_s20 = scalar_lea.vmem [#allocation11], %s909_s9  ;;  %s1190_s9 = scalar_lea.hbm %s1547_s7, 16 }
 0x330   : > { %v447_v55 = vpop.xlane.xlu1 %446 }
 0x331   : > { %v448_v56 = vsub.f32 %v444_v44, %v447_v55 }
 0x333   : > { %v449_v57 = vmul.f32 1.442695, %v448_v56 }
 0x335   : > { %1034 = vpow2.f32 %v449_v57 }
 0x33b   : > { %v1035_v58 = vpop.eup %1034 }
 0x33c   : > { %v451_v59 = vsel %vm419_vm5, %v1035_v58, 0.0 }
 0x33d   : > { %v612_v60 = vpop.xlane.xlu0 %611  ;;  %452 = vadd.xlane.f32.xlu1 %v451_v59 }
 0x33e   : > { %v613_v61 = vsub.f32 %v609_v47, %v612_v60  ;;  %v527_v62 = vpop.xlane.xlu2 %526 }
 0x33f   : > { %v528_v63 = vsub.f32 %v524_v49, %v527_v62 }
 0x340   : > { %v614_v1 = vmul.f32 1.442695, %v613_v61 }
 0x341   : > { %v529_v2 = vmul.f32 1.442695, %v528_v63 }
 0x342   : > { %1036 = vpow2.f32 %v614_v1 }
 0x343   : > { %1038 = vpow2.f32 %v529_v2 }
 0x346   : > { %v697_v3 = vpop.xlane.xlu2 %696 }
 0x347   : > { %v698_v4 = vsub.f32 %v694_v53, %v697_v3 }
 0x348   : > { %v1470_v5 = vpop.eup %1036 }
 0x349   : > { %v1472_v6 = vpop.eup %1038  ;;  %v699_v7 = vmul.f32 1.442695, %v698_v4  ;;  %v616_v8 = vsel %vm419_vm5, %v1470_v5, 0.0 }
 0x34a   : > { %617 = vadd.xlane.f32.xlu1 %v616_v8  ;;  %v531_v9 = vsel %vm419_vm5, %v1472_v6, 0.0  ;;  %v753_v8 = vld [vmem:[#allocation9 + $0x8] sm:$0xff] }
 0x34b   : > { %1040 = vpow2.f32 %v699_v7  ;;  %532 = vadd.xlane.f32.xlu2 %v531_v9  ;;  %v754_v7 = vld [vmem:[#allocation9 + $0x10] sm:$0xff]  ;;  %v752_v9 = vld [vmem:[#allocation9] sm:$0xff] }
 0x34e   : > { %v470_v10 = vpop.permute.xlu2 %469 }
 0x34f   : > { %490 = vmatpush.msra.mxu2 %v470_v10 }
 0x351   : > { %v1478_v11 = vpop.eup %1040 }
 0x352   : > { %v701_v12 = vsel %vm419_vm5, %v1478_v11, 0.0 }
 0x353   : > { %702 = vadd.xlane.f32.xlu0 %v701_v12 }
 0x363   : > { %719 = vrot.lane.b32.xlu2 %v1446_v35, %s1260_s1  ;;  %549 = vrot.lane.b32.xlu1 %v1446_v35, %s1261_s30  ;;  %s798_s1 = sshll.u32 %s343_s20, 4  ;;  %s800_s30 = sshll.u32 %s796_s23, 4  ;;  %s799_s1 = int_to_ptr.vmem [resolvable:$true] %s798_s1  ;;  %s801_s30 = int_to_ptr.hbm [resolvable:$true] %s800_s30 }
 0x367   : > { %634 = vrot.lane.b32.xlu0 %v1446_v35, %s1262_s12  ;;  %s1184_s12 = sshra.s32 %s801_s30, 4  ;;  %s1185_s12 = int_to_ptr.hbm [resolvable:$true] %s1184_s12 }
 0x368   : > { %p1191_p9 = scmp.lt.s32.totalorder %s1185_s12, %s1547_s7 }
 0x3b0   : > { %v453_v13 = vpop.xlane.xlu1 %452 }
 0x3b1   : > { %1042 = vrcp.f32 %v453_v13  ;;  %v465_v18 = vand.u32 2147483648, %v453_v13  ;;  %v463_v21 = vand.u32 2147483647, %v453_v13  ;;  %vm459_vm7 = vweird.f32 %v453_v13 }
 0x3b3   : > { %v466_v23 = vor.u32 1.1754944e-38, %v465_v18  ;;  %vm464_vm9 = vcmp.eq.f32.partialorder %v463_v21, 8.507059e+37 }
 0x3b7   : > { %v1043_v14 = vpop.eup %1042 }
 0x3b8   : > { %v455_v15 = vmul.f32 %v1043_v14, %v453_v13  ;;  %vm460_vm6 = vweird.f32 %v1043_v14 }
 0x3b9   : > { %vm461_vm8 = vmor %vm459_vm7, %vm460_vm6 }
 0x3ba   : > { %v456_v16 = vsub.f32 1.0, %v455_v15 }
 0x3bc   : > { %v457_v17 = vmul.f32 %v1043_v14, %v456_v16 }
 0x3bd   : > { %v618_v19 = vpop.xlane.xlu1 %617 }
 0x3be   : > { %1044 = vrcp.f32 %v618_v19  ;;  %v533_v20 = vpop.xlane.xlu2 %532  ;;  %v458_v22 = vadd.f32 %v1043_v14, %v457_v17  ;;  %v630_v43 = vand.u32 2147483648, %v618_v19  ;;  %vm624_vm14 = vweird.f32 %v618_v19 }
 0x3bf   : > { %1046 = vrcp.f32 %v533_v20  ;;  %v545_v37 = vand.u32 2147483648, %v533_v20  ;;  %vm539_vm11 = vweird.f32 %v533_v20  ;;  %v543_v39 = vand.u32 2147483647, %v533_v20 }
 0x3c0   : > { %v462_v24 = vsel %vm461_vm8, %v1043_v14, %v458_v22  ;;  %v628_v46 = vand.u32 2147483647, %v618_v19  ;;  %v631_v51 = vor.u32 1.1754944e-38, %v630_v43  ;;  %vm664_vm8 = vcmask 195712   ;;  %v1029_v14 = vld [vmem:[%s1546_s6] ss:$0 sm:$0xff] }
 0x3c1   : > { %v467_v25 = vsel %vm464_vm9, %v466_v23, %v462_v24  ;;  %v546_v44 = vor.u32 1.1754944e-38, %v545_v37  ;;  %vm544_vm15 = vcmp.eq.f32.partialorder %v543_v39, 8.507059e+37  ;;  %vm749_vm9 = vcmask 261312  }
 0x3c2   : > { %v468_v27 = vmul.f32 %v1035_v58, %v467_v25  ;;  %vm629_vm3 = vcmp.eq.f32.partialorder %v628_v46, 8.507059e+37 }
 0x3c4   : > { %v1045_v26 = vpop.eup %1044  ;;  %917 = vmatmul.msk.f32.vlgmr.msra.gmra.mxu2 %vm419_vm5, %v468_v27 }
 0x3c5   : > { %v1047_v28 = vpop.eup %1046  ;;  %v620_v29 = vmul.f32 %v1045_v26, %v618_v19  ;;  %vm625_vm13 = vweird.f32 %v1045_v26 }
 0x3c6   : > { %v535_v30 = vmul.f32 %v1047_v28, %v533_v20  ;;  %v703_v31 = vpop.xlane.xlu0 %702  ;;  %vm540_vm10 = vweird.f32 %v1047_v28  ;;  %vm1486_vm1 = vmor %vm624_vm14, %vm625_vm13  ;;  %v720_v58 = vpop.permute.xlu2 %719 }
 0x3c7   : > { %v621_v32 = vsub.f32 1.0, %v620_v29  ;;  %1048 = vrcp.f32 %v703_v31  ;;  %vm541_vm12 = vmor %vm539_vm11, %vm540_vm10  ;;  %v715_v53 = vand.u32 2147483648, %v703_v31  ;;  %vm709_vm4 = vweird.f32 %v703_v31 }
 0x3c8   : > { %v536_v33 = vsub.f32 1.0, %v535_v30  ;;  %v713_v54 = vand.u32 2147483647, %v703_v31 }
 0x3c9   : > { %v622_v35 = vmul.f32 %v1045_v26, %v621_v32  ;;  %v716_v60 = vor.u32 1.1754944e-38, %v715_v53 }
 0x3ca   : > { %v537_v34 = vmul.f32 %v1047_v28, %v536_v33  ;;  %vm714_vm7 = vcmp.eq.f32.partialorder %v713_v54, 8.507059e+37 }
 0x3cb   : > { %v623_v41 = vadd.f32 %v1045_v26, %v622_v35 }
 0x3cc   : > { %v538_v36 = vadd.f32 %v1047_v28, %v537_v34 }
 0x3cd   : > { %v1049_v38 = vpop.eup %1048  ;;  %v627_v50 = vsel %vm1486_vm1, %v1045_v26, %v623_v41 }
 0x3ce   : > { %v705_v40 = vmul.f32 %v1049_v38, %v703_v31  ;;  %v542_v42 = vsel %vm541_vm12, %v1047_v28, %v538_v36  ;;  %vm710_vm2 = vweird.f32 %v1049_v38  ;;  %v632_v57 = vsel %vm629_vm3, %v631_v51, %v627_v50 }
 0x3cf   : > { %v547_v49 = vsel %vm544_vm15, %v546_v44, %v542_v42  ;;  %vm711_vm6 = vmor %vm709_vm4, %vm710_vm2  ;;  %v633_v62 = vmul.f32 %v1470_v5, %v632_v57  ;;  %v755_v5 = vld [vmem:[#allocation9 + $0x18] sm:$0xff] }
 0x3d0   : > { %v706_v45 = vsub.f32 1.0, %v705_v40  ;;  %v548_v56 = vmul.f32 %v1472_v6, %v547_v49  ;;  %775 = vmatpush.msra.mxu1 %v755_v5 }
 0x3d2   : > { %v707_v48 = vmul.f32 %v1049_v38, %v706_v45  ;;  %776 = vmatpush.msra.mxu1 %v754_v7 }
 0x3d4   : > { %v708_v52 = vadd.f32 %v1049_v38, %v707_v48  ;;  %777 = vmatpush.msra.mxu1 %v753_v8 }
 0x3d5   : > { %v550_v55 = vpop.permute.xlu1 %549 }
 0x3d6   : > { %570 = vmatpush.msrb.mxu2 %v550_v55  ;;  %v712_v59 = vsel %vm711_vm6, %v1049_v38, %v708_v52  ;;  %778 = vmatpush.msra.mxu1 %v752_v9 }
 0x3d7   : > { %920 = vmatmul.msk.f32.vlgmr.msrb.gmra.mxu2 %vm419_vm5, %v548_v56  ;;  %v717_v63 = vsel %vm714_vm7, %v716_v60, %v712_v59 }
 0x3d8   : > { %740 = vmatpush.msra.mxu2 %v720_v58  ;;  %v718_v1 = vmul.f32 %v1478_v11, %v717_v63 }
 0x3d9   : > { %v635_v61 = vpop.permute.xlu0 %634 }
 0x3da   : > { %655 = vmatpush.msrb.mxu3 %v635_v61 }
 0x3db   : > { %923 = vmatmul.msk.f32.vlgmr.msrb.gmra.mxu3 %vm419_vm5, %v633_v62 }
 0x3df   : > { %926 = vmatmul.msk.f32.vlgmr.msra.gmra.mxu2 %vm419_vm5, %v718_v1 }
 0x447   : > { %v492_v2 = vpop.f32.mrf.mxu2 }
 0x448   : > { %495 = vst.msk [vmem:[#allocation2] sm:$0xff] %vm419_vm5, %v492_v2  ;;  %vm579_vm5 = vcmask 130112  }
 0x45a   : > { %v572_v3 = vpop.f32.mrf.mxu2 }
 0x45b   : > { %576 = vrot.lane.b32.xlu0 %v572_v3, %s1263_s29  ;;  %s1186_s29 = scalar_lea.hbm %s1185_s12, 8 }
 0x45c   : > { %p1187_p1 = scmp.ne.s32.totalorder %s1185_s12, %s1186_s29  ;;  %p1192_p10 = scmp.lt.s32.totalorder %s1190_s9, %s1186_s29 }
 0x45e   : > { %v657_v4 = vpop.f32.mrf.mxu3  ;;  %p1188_p4 = pnand %p1187_p1, %p1388_p3  ;;  %p1193_p2 = por %p1192_p10, %p1191_p9 }
 0x45f   : > { %661 = vrot.lane.b32.xlu1 %v657_v4, %s1264_s10 }
 0x460   : > { %p1189_p8 = pneg %p1188_p4 }
 0x462   : > { %v742_v6 = vpop.f32.mrf.mxu2  ;;  %p1194_p11 = pnand %p1193_p2, %p1189_p8 }
 0x463   : > { %746 = vrot.lane.b32.xlu2 %v742_v6, %s1265_s13 }
 0x4bd   : > { %v747_v12 = vpop.permute.xlu2 %746 }
 0x4cd   : > { %v577_v10 = vpop.permute.xlu0 %576 }
 0x4ce   : > { %580 = vst.msk [vmem:[#allocation2] sm:$0xff] %vm579_vm5, %v577_v10 }
 0x4d1   : > { %v662_v11 = vpop.permute.xlu1 %661 }
 0x4d2   : > { %665 = vst.msk [vmem:[#allocation2] sm:$0xff] %vm664_vm8, %v662_v11 }
 0x4d3   : > { %750 = vst.msk [vmem:[#allocation2] sm:$0xff] %vm749_vm9, %v747_v12 }
 0x4da   : > { %v751_v13 = vld [vmem:[#allocation2] sm:$0xff] }
 0x4db   : > { %927 = vmatmul.msk.f32.vlgmr.msra.gmra.mxu1 %vm347_vm0, %v751_v13 }
 0x558   : > { %v780_v15 = vpop.f32.mrf.mxu1 }
 0x559   : > { %v781_v16 = vadd.f32 %v1029_v14, %v780_v15 }
 0x55b   : > { %v783_v17 = vadd.f32 %v781_v16, %v1433_v0 }
 0x55d   : > { %784 = vst.msk [vmem:[%s343_s20] sm:$0xff] %vm347_vm0, %v783_v17 }
 0x55e   : > { %1197 = shalt.err (!%p1194_p11)
}
 0x55f   : > { %946 = dma.vmem_to_hbm [thread:$0]  (%p1388_p3), %s799_s1, 128, %s801_s30, %s786_s28  }
 0x560 PF: > { %s812_s19 = sand.u32 1, %s1232_s24   ;;  %p1558_p12 = scmp.ge.s32.totalorder %s1244_s27, 2 }
 0x561   : > { %s813_s21 = scalar_lea.sflag [#allocation5], %s812_s19 }
 0x562   : > { %p963_p13 = pnand %p1558_p12, %p1341_p6 }
 0x564   : > { %p964_p0 = pneg %p963_p13 }
 0x566   : > { %1227 = dma.done.wait (%p964_p0), %s813_s21, 128  }
 0x567   : > { %1229 = vsyncadd (%p964_p0), %s813_s21, 4294967168  ;;  %p22_p5 = scmp.ge.s32.totalorder %s1375_s11, 4   ;;  %s1559_s24 = smov %s1236_s25 }
 0x568   : > { %s1560_s25 = smov %s1240_s26  ;;  %s1561_s26 = smov %s1384_s16 }
 0x569   : > { %s1562_s27 = smov %s1375_s11  ;;  %24 = sbr.rel (!%p22_p5) target bundleno = 9 (0x9), region = 105 }
 0x56e   :  { %819 = vsyncpa [#allocation4], 1 }
 0x56f   :  { %821 = vsyncpa [#allocation4 + $0x1], 1 }
 0x570   :  { %822 = vsyncpa [#allocation7], 1 }
 0x571   :  { %823 = vsyncpa [#allocation10], 1 }
 0x572   :  { %824 = vsyncpa [#allocation5], 1 }
 0x573   :  { %826 = vsyncpa [#allocation5 + $0x1], 1 }

</bundles_post_ra>
